<compile_context>
chip_gen: v6e
topology: v6e:2x2x1
jax: 0.10.0
libtpu: 0.0.40
codegen_flags: <defaults>
</compile_context>

<pallas_src>
import math

import jax
import jax.numpy as jnp
from jax.experimental import pallas as pl
from jax.experimental.pallas import tpu as pltpu


def _round_up(x, m):
    return ((x + m - 1) // m) * m


def _packed_linear_kernel(x_ref, w_ref, b_ref, o_ref):
    # Lane-dense (TM_G, G*K) @ (G*K, G*N) MXU matmul + fused bias.
    # Cast x to the (bf16) weight dtype so the MXU does a single pass even on
    # v5e (multi-pass f32 would out-cost the HBM stream); accumulate in f32.
    x = x_ref[...].astype(w_ref.dtype)
    acc = jnp.dot(x, w_ref[...], preferred_element_type=jnp.float32)
    o_ref[...] = (acc + b_ref[...]).astype(o_ref.dtype)


def pack_linear_params(weight, bias, *, compute_dtype=jnp.bfloat16):
    """Precompute block-diagonal packed weight / tiled bias (once per model)."""
    N, K = weight.shape
    G = 128 // math.gcd(N, 128)           # rows per packed row -> (G*N) % 128 == 0
    w_pack = jnp.kron(jnp.eye(G, dtype=weight.dtype), weight.T)      # (G*K, G*N)
    w_pack = w_pack.astype(compute_dtype)
    b_pack = jnp.tile(bias.astype(jnp.float32), G).reshape(1, G * N)  # (1, G*N)
    return G, w_pack, b_pack


def _packed_linear(x2d, G, w_pack, b_pack, N, *, tile_rows_packed):
    """x2d (M, K) -> (M, N) via the packed Pallas linear kernel."""
    M, K = x2d.shape
    GK, GN = G * K, G * N
    out_dtype = x2d.dtype

    # Pad rows only to the 8*G granularity needed for the packed reshape and
    # sublane alignment (<= 63 junk rows, independent of M).  When M is already
    # a multiple of 8*G this path is completely copy-free: the reshape below is
    # a row-major bitcast.
    MG = pl.cdiv(M, G)
    MG_pad = _round_up(max(MG, 8), 8)
    M_pad = MG_pad * G
    if M_pad != M:
        x2d = jnp.pad(x2d, ((0, M_pad - M), (0, 0)))
    x_pack = x2d.reshape(MG_pad, GK)

    # Tile selection: large enough to amortize ~0.35 us/step pipeline overhead
    # (dominant loss on v7x HBM), capped so there are >=2 grid steps whenever
    # possible for megacore sharding of the "parallel" axis.
    TM_G = max(8, _round_up(min(tile_rows_packed, MG_pad), 8))
    if MG_pad >= 16:
        TM_G = min(TM_G, _round_up(pl.cdiv(MG_pad, 2), 8))
    grid = (pl.cdiv(MG_pad, TM_G),)       # ragged last block: Pallas masks OOB

    x_itemsize = jnp.dtype(x2d.dtype).itemsize
    o_itemsize = jnp.dtype(out_dtype).itemsize
    w_bytes = w_pack.size * jnp.dtype(w_pack.dtype).itemsize
    step_bytes = TM_G * GK * x_itemsize + TM_G * GN * o_itemsize
    # Explicit scoped-VMEM budget: 2x (double-buffered x/out tiles) + resident
    # weight/bias + headroom.  Avoids v5e's 16 MiB default clamping large tiles
    # while staying well inside v7x's 64 MiB physical VMEM.
    vmem_limit = int(min(max(2 * step_bytes + w_bytes + (2 << 20), 8 << 20),
                         64 << 20))

    cost = pl.CostEstimate(
        flops=2 * M * K * N,              # true (un-inflated) flops
        transcendentals=0,
        bytes_accessed=(MG_pad * GK * x_itemsize + w_bytes + GN * 4
                        + MG_pad * GN * o_itemsize),
    )

    out_pack = pl.pallas_call(
        _packed_linear_kernel,
        out_shape=jax.ShapeDtypeStruct((MG_pad, GN), out_dtype),
        grid_spec=pltpu.PrefetchScalarGridSpec(
            num_scalar_prefetch=0,
            grid=grid,
            in_specs=[
                pl.BlockSpec((TM_G, GK), lambda i: (i, 0)),        # streamed rows
                pl.BlockSpec((GK, GN), lambda i: (0, 0),
                             pipeline_mode=pl.Buffered(1)),        # resident weight
                pl.BlockSpec((1, GN), lambda i: (0, 0),
                             pipeline_mode=pl.Buffered(1)),        # resident bias
            ],
            out_specs=pl.BlockSpec((TM_G, GN), lambda i: (i, 0)),
        ),
        compiler_params=pltpu.CompilerParams(
            dimension_semantics=("parallel",),     # megacore sharding on v7x
            vmem_limit_bytes=vmem_limit),
        cost_estimate=cost,
    )(x_pack, w_pack, b_pack)

    out = out_pack.reshape(M_pad, N)
    if M_pad != M:
        out = out[:M]                     # padded rows hold `bias`; drop them
    return out


def attention_prediction_layer(attention, weight, bias, *,
                               tile_rows_packed=4096,
                               compute_dtype=jnp.bfloat16,
                               small_m_threshold=8192,
                               force_pallas=False):
    """Pallas implementation of AttentionPredictionLayer.forward.

    attention : (..., K) float32
    weight    : (N, K)   float32   (PyTorch nn.Linear layout)
    bias      : (N,)     float32
    returns   : (..., N) in attention.dtype
    """
    *lead, K = attention.shape
    N = weight.shape[0]
    M = 1
    for d in lead:
        M *= d

    # Small-M fast path: a fused XLA matmul beats pallas_call dispatch and the
    # pack/pad plumbing until there are O(10k) rows to stream.
    if M < small_m_threshold and not force_pallas:
        return jnp.einsum('...k,nk->...n', attention, weight) + bias

    G, w_pack, b_pack = pack_linear_params(weight, bias, compute_dtype=compute_dtype)
    out = _packed_linear(attention.reshape(M, K), G, w_pack, b_pack, N,
                         tile_rows_packed=tile_rows_packed)
    return out.reshape(*lead, N)


def make_attention_prediction_layer(weight, bias, *,
                                    tile_rows_packed=4096,
                                    compute_dtype=jnp.bfloat16):
    """Factory: pack weight/bias once per model, return a jitted forward."""
    N = weight.shape[0]
    G, w_pack, b_pack = pack_linear_params(weight, bias, compute_dtype=compute_dtype)

    @jax.jit
    def fwd(attention):
        *lead, K = attention.shape
        M = 1
        for d in lead:
            M *= d
        out = _packed_linear(attention.reshape(M, K), G, w_pack, b_pack, N,
                             tile_rows_packed=tile_rows_packed)
        return out.reshape(*lead, N)

    return fwd


if __name__ == "__main__":
    # Module config: numberOfCapsule (in) = 32, numberOfClass (out) = 16.
    numberOfCapsule = 32
    numberOfClass = 16
    batch, seq = 2, 8

    key = jax.random.PRNGKey(0)
    k_x, k_w, k_b, k_x2 = jax.random.split(key, 4)

    attention = jax.random.normal(
        k_x, (batch, seq, numberOfCapsule), dtype=jnp.float32)
    weight = jax.random.normal(
        k_w, (numberOfClass, numberOfCapsule), dtype=jnp.float32) * 0.1
    bias = jax.random.normal(k_b, (numberOfClass,), dtype=jnp.float32) * 0.01

    ref = attention @ weight.T + bias

    # 1) Pallas path at the module-sized demo shape (packed weights precomputed
    #    once by the factory; force past the small-M XLA fast path).
    fwd_pallas = make_attention_prediction_layer(weight, bias)
    probs = fwd_pallas(attention)
    jax.block_until_ready(probs)
    assert probs.shape == (batch, seq, numberOfClass)
    assert jnp.allclose(probs, ref, atol=3e-2, rtol=3e-2), \
        float(jnp.max(jnp.abs(probs - ref)))

    # 2) Default wrapper takes the small-M XLA fast path and agrees tightly.
    fwd_auto = jax.jit(attention_prediction_layer)
    probs_auto = fwd_auto(attention, weight, bias)
    jax.block_until_ready(probs_auto)
    assert jnp.allclose(probs_auto, ref, atol=1e-4, rtol=1e-4)

    # 3) Multi-step grid with unaligned M and a ragged last block (exercises the
    #    minimal-pad path and Pallas out-of-bounds block masking).
    x_big = jax.random.normal(k_x2, (1000, numberOfCapsule), dtype=jnp.float32)
    probs_big = jax.jit(
        lambda a: attention_prediction_layer(
            a, weight, bias, force_pallas=True, tile_rows_packed=48))(x_big)
    jax.block_until_ready(probs_big)
    ref_big = x_big @ weight.T + bias
    assert probs_big.shape == (1000, numberOfClass)
    assert jnp.allclose(probs_big, ref_big, atol=3e-2, rtol=3e-2), \
        float(jnp.max(jnp.abs(probs_big - ref_big)))

    print("KERNEL_OK")
</pallas_src>

<mosaic_0001>
module attributes {stable_mosaic.version = 11 : i64} {
  func.func @_packed_linear_kernel(%arg0: i32, %arg1: memref<8x256xf32, #tpu.memory_space<vmem>>, %arg2: memref<256x128xbf16, #tpu.memory_space<vmem>>, %arg3: memref<1x128xf32, #tpu.memory_space<vmem>>, %arg4: memref<8x128xf32, #tpu.memory_space<vmem>>) attributes {dimension_semantics = [#tpu.dimension_semantics<parallel>], iteration_bounds = array<i64: 1>, scalar_prefetch = 0 : i64, scratch_operands = 0 : i64, tpu.core_type = #tpu.core_type<tc>, window_params = [{transform_indices = @transform_0, window_bounds = array<i64: 8, 256>}, {pipeline_mode = #tpu.pipeline_mode<synchronous>, transform_indices = @transform_1, window_bounds = array<i64: 256, 128>}, {pipeline_mode = #tpu.pipeline_mode<synchronous>, transform_indices = @transform_2, window_bounds = array<i64: 1, 128>}, {transform_indices = @transform_3, window_bounds = array<i64: 8, 128>}]} {
    %c0 = arith.constant 0 : index
    %c0_0 = arith.constant 0 : index
    %0 = vector.load %arg1[%c0, %c0_0] : memref<8x256xf32, #tpu.memory_space<vmem>>, vector<8x256xf32>
    %1 = arith.truncf %0 : vector<8x256xf32> to vector<8x256xbf16>
    %c0_1 = arith.constant 0 : index
    %c0_2 = arith.constant 0 : index
    %2 = vector.load %arg2[%c0_1, %c0_2] : memref<256x128xbf16, #tpu.memory_space<vmem>>, vector<256x128xbf16>
    %cst = arith.constant dense<0.000000e+00> : vector<8x128xf32>
    %3 = tpu.matmul %1, %2, %cst {dimension_numbers = #tpu.dot_dimension_numbers<[1], [0], [0], [1], [0, 0, 1, 1], [], []>} : vector<8x256xbf16>, vector<256x128xbf16>, vector<8x128xf32> -> vector<8x128xf32>
    %c0_3 = arith.constant 0 : index
    %c0_4 = arith.constant 0 : index
    %4 = vector.load %arg3[%c0_3, %c0_4] : memref<1x128xf32, #tpu.memory_space<vmem>>, vector<1x128xf32>
    %5 = vector.broadcast %4 : vector<1x128xf32> to vector<8x128xf32>
    %6 = arith.addf %3, %5 : vector<8x128xf32>
    %c0_5 = arith.constant 0 : index
    %c0_6 = arith.constant 0 : index
    %7 = vector.load %arg4[%c0_5, %c0_6] : memref<8x128xf32, #tpu.memory_space<vmem>>, vector<8x128xf32>
    tpu.vector_store %arg4[%c0_5, %c0_6], %6 {strides = array<i32>} : memref<8x128xf32, #tpu.memory_space<vmem>>, vector<8x128xf32>,
    return
  }
  func.func @transform_0(%arg0: i32) -> (i32, i32) {
    %c0_i32 = arith.constant 0 : i32
    %c0_i32_0 = arith.constant 0 : i32
    return %arg0, %c0_i32 : i32, i32
  }
  func.func @transform_1(%arg0: i32) -> (i32, i32) {
    %c0_i32 = arith.constant 0 : i32
    %c0_i32_0 = arith.constant 0 : i32
    %c0_i32_1 = arith.constant 0 : i32
    return %c0_i32, %c0_i32_0 : i32, i32
  }
  func.func @transform_2(%arg0: i32) -> (i32, i32) {
    %c0_i32 = arith.constant 0 : i32
    %c0_i32_0 = arith.constant 0 : i32
    %c0_i32_1 = arith.constant 0 : i32
    return %c0_i32, %c0_i32_0 : i32, i32
  }
  func.func @transform_3(%arg0: i32) -> (i32, i32) {
    %c0_i32 = arith.constant 0 : i32
    %c0_i32_0 = arith.constant 0 : i32
    return %arg0, %c0_i32 : i32, i32
  }
}

</mosaic_0001>

<bundles_post_ra>
// kernel: fwd.1
= control target key start
LH: loop header
LB: loop body
LE: loop exit
PB: predicated region body
PF: predicated region fallthrough
CT: control target
= control target key end

     0   :  { %s334_s1 = inlined_call_operand.vmem [shape: bf16[256,128], index: 1, kind: input, shape index: {}]   ;;  %s335_s0 = inlined_call_operand.vmem [shape: f32[8,256], index: 0, kind: input, shape index: {}]   ;;  %s336_s2 = inlined_call_operand.vmem [shape: f32[1,128], index: 2, kind: input, shape index: {}]   ;;  %s337_s3 = inlined_call_operand.vmem [shape: f32[8,128], index: 3, kind: output, shape index: {}]  }
   0x1   :  { %v238_v0 = vld [vmem:[%s334_s1 + $0x78] sm:$0xff]   ;;  %v240_v2 = vld [vmem:[%s334_s1 + $0x70] sm:$0xff]   ;;  %v242_v4 = vld [vmem:[%s334_s1 + $0x68] sm:$0xff]  }
   0x2   :  { %v239_v1 = vld [vmem:[%s334_s1 + $0x38] sm:$0xff]   ;;  %216 = vmatprep.subr.bf16.mxu0 %v238_v0  ;;  %v241_v3 = vld [vmem:[%s334_s1 + $0x30] sm:$0xff]   ;;  %v243_v5 = vld [vmem:[%s334_s1 + $0x28] sm:$0xff]  }
   0x3   :  { %217 = vmatpush3.bf16.msra.mxu0 %v239_v1  ;;  %v244_v6 = vld [vmem:[%s334_s1 + $0x60] sm:$0xff]   ;;  %v246_v8 = vld [vmem:[%s334_s1 + $0x58] sm:$0xff]   ;;  %v248_v10 = vld [vmem:[%s334_s1 + $0x50] sm:$0xff]  }
   0x4   :  { %218 = vmatprep.subr.bf16.mxu0 %v240_v2  ;;  %v245_v7 = vld [vmem:[%s334_s1 + $0x20] sm:$0xff]   ;;  %v247_v9 = vld [vmem:[%s334_s1 + $0x18] sm:$0xff]   ;;  %v16_v11 = vld [vmem:[%s335_s0 + $0x8] sm:$0xff] }
   0x5   :  { %v18_v12 = vpack.c.bf16 %v16_v11, %v16_v11  ;;  %v249_v13 = vld [vmem:[%s334_s1 + $0x10] sm:$0xff]   ;;  %v250_v14 = vld [vmem:[%s334_s1 + $0x48] sm:$0xff]   ;;  %v252_v16 = vld [vmem:[%s334_s1 + $0x40] sm:$0xff]  }
   0x6   :  { %v251_v15 = vld [vmem:[%s334_s1 + $0x8] sm:$0xff]   ;;  %v253_v17 = vld [vmem:[%s334_s1] sm:$0xff]  }
   0x7   :  { %219 = vmatpush3.bf16.msra.mxu0 %v241_v3  ;;  %186 = vmatprep.mubr.bf16.mxu0 %v18_v12  ;;  %v15_v18 = vld [vmem:[%s335_s0] sm:$0xff] }
   0x8   :  { %220 = vmatprep.subr.bf16.mxu0 %v242_v4  ;;  %v17_v19 = vpack.c.bf16 %v15_v18, %v15_v18  ;;  %v199_v21 = vld [vmem:[%s336_s2] ss:$0 sm:$0xff] }
   0xb   :  { %221 = vmatpush3.bf16.msra.mxu0 %v243_v5 }
   0xc   :  { %222 = vmatprep.subr.bf16.mxu0 %v244_v6 }
   0xf   :  { %223 = vmatpush3.bf16.msra.mxu0 %v245_v7 }
  0x10   :  { %224 = vmatprep.subr.bf16.mxu0 %v246_v8 }
  0x13   :  { %225 = vmatpush3.bf16.msra.mxu0 %v247_v9 }
  0x14   :  { %226 = vmatprep.subr.bf16.mxu0 %v248_v10 }
  0x17   :  { %227 = vmatpush3.bf16.msra.mxu0 %v249_v13 }
  0x18   :  { %228 = vmatprep.subr.bf16.mxu0 %v250_v14 }
  0x1b   :  { %229 = vmatpush3.bf16.msra.mxu0 %v251_v15 }
  0x1c   :  { %230 = vmatprep.subr.bf16.mxu0 %v252_v16 }
  0x1f   :  { %231 = vmatpush3.bf16.msra.mxu0 %v253_v17 }
  0x22   :  { %187 = vmatmul.mubr.bf16.vlgmr.msra.gmra.mxu0 %v17_v19 }
  0xe2   :  { %v232_v20 = vpop.f32.mrf.mxu0 }
  0xe4   :  { %v233_v22 = vpop.f32.mrf.mxu0 }
  0xe5   :  { %v234_v23 = vadd.f32 %v233_v22, %v232_v20 }
  0xe6   :  { %v235_v24 = vpop.f32.mrf.mxu0 }
  0xe7   :  { %v189_v25 = vadd.f32 %v234_v23, %v199_v21 }
  0xe8   :  { %v236_v26 = vpop.f32.mrf.mxu0 }
  0xe9   :  { %194 = vst [vmem:[%s337_s3] sm:$0xff] %v189_v25 }

</bundles_post_ra>
